<compile_context>
chip_gen: v7x
topology: tpu7x:2x2x1
jax: 0.10.0
libtpu: 0.0.40
codegen_flags: <defaults>
</compile_context>

<pallas_src>
import jax
import jax.numpy as jnp
from jax.experimental import pallas as pl
from jax.experimental.pallas import tpu as pltpu

IN_DIM = 3
HIDDEN = 64
# TODO(synk): data.csv is not available; setpoint_velocity.shape[1] is fixed at 3.
OUT_DIM = 3

LANE = 128
SUBLANE = 8


def _round_up(n, m):
    return ((n + m - 1) // m) * m


def _mlp_kernel(x_ref, w1_ref, b1_ref, w2_ref, b2_ref, w3_ref, b3_ref, o_ref):
    """Transposed layout: batch on the lane (last) axis.

    x_ref : (IN_DIM, Nt) f32      w1 : (HIDDEN, IN_DIM) f32   b1 : (HIDDEN, 1) f32
    h1/h2 : (HIDDEN, Nt)          w2 : (HIDDEN, HIDDEN) bf16  b2 : (HIDDEN, 1) f32
    out   : (8, Nt) f32           w3 : (8, HIDDEN)      bf16  b3 : (8, 1) f32
    """
    x = x_ref[...]
    w1 = w1_ref[...]

    # Layer 1 has K=3: VPU broadcast multiply-adds (a 3-deep contraction would
    # waste the 128/256-deep MXU); kept as one fused add chain.
    h1 = (w1[:, 0:1] * x[0:1, :]
          + w1[:, 1:2] * x[1:2, :]
          + w1[:, 2:3] * x[2:3, :]
          + b1_ref[...])
    h1 = jnp.tanh(h1).astype(jnp.bfloat16)

    # Layers 2 and 3 on the MXU in bf16 with f32 accumulation; batch (N) is the
    # lane-saturated dimension.
    h2 = jnp.dot(w2_ref[...], h1, preferred_element_type=jnp.float32) + b2_ref[...]
    h2 = jnp.tanh(h2).astype(jnp.bfloat16)
    out = jnp.dot(w3_ref[...], h2, preferred_element_type=jnp.float32) + b3_ref[...]
    o_ref[...] = out.astype(o_ref.dtype)


def velocity_predictor(x, params, *, batch_tile=4096):
    """x: [N, 3] float32 -> [N, OUT_DIM] float32 (same semantics as the torch MLP)."""
    w1, b1, w2, b2, w3, b3 = params
    n = x.shape[0]
    out_rows = _round_up(OUT_DIM, SUBLANE)  # pad output rows to a full sublane group

    # Lane-aligned batch tile: always a multiple of 128.
    bt = _round_up(max(int(batch_tile), LANE), LANE)
    n_lanes = _round_up(n, LANE)
    if n_lanes < bt:
        bt = n_lanes
    # If the whole batch fits in one tile and there are >= 2 lane groups, split
    # into two balanced lane-aligned tiles so both v7x TensorCores get work
    # (costs one extra ~0.35us grid step on single-TC chips — negligible).
    if bt == n_lanes and n_lanes >= 2 * LANE:
        bt = _round_up((n_lanes + 1) // 2, LANE)
    grid = (pl.cdiv(n, bt),)

    # Layout plumbing stays in the XLA wrapper, not the kernel.
    x_t = x.T                                        # [IN_DIM, N], no explicit pad
    b1c = b1.reshape(HIDDEN, 1)
    b2c = b2.reshape(HIDDEN, 1)
    # Zero-pad W3/b3 to 8 output rows -> (8, bt) output blocks, unmasked stores.
    w3p = jnp.zeros((out_rows, HIDDEN), jnp.float32).at[:OUT_DIM].set(w3)
    b3p = jnp.zeros((out_rows, 1), jnp.float32).at[:OUT_DIM, 0].set(b3)
    # bf16 weights for the MXU layers (accumulation stays f32 in the kernel).
    w2b = w2.astype(jnp.bfloat16)
    w3b = w3p.astype(jnp.bfloat16)

    def rep(shape):
        # Weights/biases are tiny; constant index_map keeps them VMEM-resident
        # across the whole grid (no per-step reloads).
        return pl.BlockSpec(shape, lambda i: (0, 0))

    out_t = pl.pallas_call(
        _mlp_kernel,
        out_shape=jax.ShapeDtypeStruct((out_rows, n), jnp.float32),
        grid_spec=pltpu.PrefetchScalarGridSpec(
            num_scalar_prefetch=0,
            grid=grid,
            in_specs=[
                pl.BlockSpec((IN_DIM, bt), lambda i: (0, i)),   # x^T tile
                rep((HIDDEN, IN_DIM)),     # w1  [64, 3]  f32
                rep((HIDDEN, 1)),          # b1           f32
                rep((HIDDEN, HIDDEN)),     # w2  [64, 64] bf16
                rep((HIDDEN, 1)),          # b2           f32
                rep((out_rows, HIDDEN)),   # w3  [8, 64]  bf16 (rows 3..7 zero)
                rep((out_rows, 1)),        # b3  [8, 1]   f32
            ],
            out_specs=pl.BlockSpec((out_rows, bt), lambda i: (0, i)),
        ),
        compiler_params=pltpu.CompilerParams(
            dimension_semantics=("parallel",),
        ),
    )(x_t, w1, b1c, w2b, b2c, w3b, b3p)

    return out_t[:OUT_DIM, :].T  # back to [N, OUT_DIM]


def init_params(key):
    """PyTorch nn.Linear-style init and layout: W is [fan_out, fan_in], b is [fan_out]."""
    ks = jax.random.split(key, 6)

    def linear(kw, kb, fan_in, fan_out):
        bound = 1.0 / jnp.sqrt(jnp.float32(fan_in))
        w = jax.random.uniform(kw, (fan_out, fan_in), jnp.float32, -bound, bound)
        b = jax.random.uniform(kb, (fan_out,), jnp.float32, -bound, bound)
        return w, b

    w1, b1 = linear(ks[0], ks[1], IN_DIM, HIDDEN)
    w2, b2 = linear(ks[2], ks[3], HIDDEN, HIDDEN)
    w3, b3 = linear(ks[4], ks[5], HIDDEN, OUT_DIM)
    return (w1, b1, w2, b2, w3, b3)


def reference(x, params):
    w1, b1, w2, b2, w3, b3 = params
    h1 = jnp.tanh(x @ w1.T + b1)
    h2 = jnp.tanh(h1 @ w2.T + b2)
    return h2 @ w3.T + b3


if __name__ == "__main__":
    key = jax.random.PRNGKey(0)
    k_x, k_p = jax.random.split(key)

    batch = 256  # small demo; wrapper tiles arbitrary N internally
    x = jax.random.normal(k_x, (batch, IN_DIM), jnp.float32)
    params = init_params(k_p)

    out = jax.block_until_ready(velocity_predictor(x, params))
    ref = reference(x, params)

    assert out.shape == (batch, OUT_DIM)
    # bf16 matmuls (f32 accumulation) vs. the pure-f32 reference: loosened tolerance.
    assert jnp.allclose(out, ref, atol=2e-2, rtol=2e-2), "mismatch vs reference"

    print("KERNEL_OK")
</pallas_src>

<mosaic_0001>
module attributes {stable_mosaic.version = 11 : i64} {
  func.func @_mlp_kernel(%arg0: i32, %arg1: memref<3x128xf32, #tpu.memory_space<vmem>>, %arg2: memref<64x3xf32, #tpu.memory_space<vmem>>, %arg3: memref<64x1xf32, #tpu.memory_space<vmem>>, %arg4: memref<64x64xbf16, #tpu.memory_space<vmem>>, %arg5: memref<64x1xf32, #tpu.memory_space<vmem>>, %arg6: memref<8x64xbf16, #tpu.memory_space<vmem>>, %arg7: memref<8x1xf32, #tpu.memory_space<vmem>>, %arg8: memref<8x128xf32, #tpu.memory_space<vmem>>) attributes {dimension_semantics = [#tpu.dimension_semantics<parallel>], iteration_bounds = array<i64: 2>, scalar_prefetch = 0 : i64, scratch_operands = 0 : i64, tpu.core_type = #tpu.core_type<tc>, window_params = [{transform_indices = @transform_0, window_bounds = array<i64: 3, 128>}, {pipeline_mode = #tpu.pipeline_mode<synchronous>, transform_indices = @transform_1, window_bounds = array<i64: 64, 3>}, {pipeline_mode = #tpu.pipeline_mode<synchronous>, transform_indices = @transform_2, window_bounds = array<i64: 64, 1>}, {pipeline_mode = #tpu.pipeline_mode<synchronous>, transform_indices = @transform_3, window_bounds = array<i64: 64, 64>}, {pipeline_mode = #tpu.pipeline_mode<synchronous>, transform_indices = @transform_4, window_bounds = array<i64: 64, 1>}, {pipeline_mode = #tpu.pipeline_mode<synchronous>, transform_indices = @transform_5, window_bounds = array<i64: 8, 64>}, {pipeline_mode = #tpu.pipeline_mode<synchronous>, transform_indices = @transform_6, window_bounds = array<i64: 8, 1>}, {transform_indices = @transform_7, window_bounds = array<i64: 8, 128>}]} {
    %c0 = arith.constant 0 : index
    %c0_0 = arith.constant 0 : index
    %0 = vector.load %arg1[%c0, %c0_0] : memref<3x128xf32, #tpu.memory_space<vmem>>, vector<3x128xf32>
    %c0_1 = arith.constant 0 : index
    %c0_2 = arith.constant 0 : index
    %1 = vector.load %arg2[%c0_1, %c0_2] : memref<64x3xf32, #tpu.memory_space<vmem>>, vector<64x3xf32>
    %2 = vector.extract_strided_slice %1 {offsets = [0, 0], sizes = [64, 1], strides = [1, 1]} : vector<64x3xf32> to vector<64x1xf32>
    %3 = vector.extract_strided_slice %0 {offsets = [0, 0], sizes = [1, 128], strides = [1, 1]} : vector<3x128xf32> to vector<1x128xf32>
    %4 = vector.broadcast %2 : vector<64x1xf32> to vector<64x128xf32>
    %5 = vector.broadcast %3 : vector<1x128xf32> to vector<64x128xf32>
    %6 = arith.mulf %4, %5 : vector<64x128xf32>
    %7 = vector.extract_strided_slice %1 {offsets = [0, 1], sizes = [64, 1], strides = [1, 1]} : vector<64x3xf32> to vector<64x1xf32>
    %8 = vector.extract_strided_slice %0 {offsets = [1, 0], sizes = [1, 128], strides = [1, 1]} : vector<3x128xf32> to vector<1x128xf32>
    %9 = vector.broadcast %7 : vector<64x1xf32> to vector<64x128xf32>
    %10 = vector.broadcast %8 : vector<1x128xf32> to vector<64x128xf32>
    %11 = arith.mulf %9, %10 : vector<64x128xf32>
    %12 = arith.addf %6, %11 : vector<64x128xf32>
    %13 = vector.extract_strided_slice %1 {offsets = [0, 2], sizes = [64, 1], strides = [1, 1]} : vector<64x3xf32> to vector<64x1xf32>
    %14 = vector.extract_strided_slice %0 {offsets = [2, 0], sizes = [1, 128], strides = [1, 1]} : vector<3x128xf32> to vector<1x128xf32>
    %15 = vector.broadcast %13 : vector<64x1xf32> to vector<64x128xf32>
    %16 = vector.broadcast %14 : vector<1x128xf32> to vector<64x128xf32>
    %17 = arith.mulf %15, %16 : vector<64x128xf32>
    %18 = arith.addf %12, %17 : vector<64x128xf32>
    %c0_3 = arith.constant 0 : index
    %c0_4 = arith.constant 0 : index
    %19 = vector.load %arg3[%c0_3, %c0_4] : memref<64x1xf32, #tpu.memory_space<vmem>>, vector<64x1xf32>
    %20 = vector.broadcast %19 : vector<64x1xf32> to vector<64x128xf32>
    %21 = arith.addf %18, %20 : vector<64x128xf32>
    %22 = math.tanh %21 : vector<64x128xf32>
    %23 = arith.truncf %22 : vector<64x128xf32> to vector<64x128xbf16>
    %c0_5 = arith.constant 0 : index
    %c0_6 = arith.constant 0 : index
    %24 = vector.load %arg4[%c0_5, %c0_6] : memref<64x64xbf16, #tpu.memory_space<vmem>>, vector<64x64xbf16>
    %cst = arith.constant dense<0.000000e+00> : vector<64x128xf32>
    %25 = tpu.matmul %24, %23, %cst {dimension_numbers = #tpu.dot_dimension_numbers<[1], [0], [0], [1], [0, 0, 1, 1], [], []>} : vector<64x64xbf16>, vector<64x128xbf16>, vector<64x128xf32> -> vector<64x128xf32>
    %c0_7 = arith.constant 0 : index
    %c0_8 = arith.constant 0 : index
    %26 = vector.load %arg5[%c0_7, %c0_8] : memref<64x1xf32, #tpu.memory_space<vmem>>, vector<64x1xf32>
    %27 = vector.broadcast %26 : vector<64x1xf32> to vector<64x128xf32>
    %28 = arith.addf %25, %27 : vector<64x128xf32>
    %29 = math.tanh %28 : vector<64x128xf32>
    %30 = arith.truncf %29 : vector<64x128xf32> to vector<64x128xbf16>
    %c0_9 = arith.constant 0 : index
    %c0_10 = arith.constant 0 : index
    %31 = vector.load %arg6[%c0_9, %c0_10] : memref<8x64xbf16, #tpu.memory_space<vmem>>, vector<8x64xbf16>
    %cst_11 = arith.constant dense<0.000000e+00> : vector<8x128xf32>
    %32 = tpu.matmul %31, %30, %cst_11 {dimension_numbers = #tpu.dot_dimension_numbers<[1], [0], [0], [1], [0, 0, 1, 1], [], []>} : vector<8x64xbf16>, vector<64x128xbf16>, vector<8x128xf32> -> vector<8x128xf32>
    %c0_12 = arith.constant 0 : index
    %c0_13 = arith.constant 0 : index
    %33 = vector.load %arg7[%c0_12, %c0_13] : memref<8x1xf32, #tpu.memory_space<vmem>>, vector<8x1xf32>
    %34 = vector.broadcast %33 : vector<8x1xf32> to vector<8x128xf32>
    %35 = arith.addf %32, %34 : vector<8x128xf32>
    %c0_14 = arith.constant 0 : index
    %c0_15 = arith.constant 0 : index
    %36 = vector.load %arg8[%c0_14, %c0_15] : memref<8x128xf32, #tpu.memory_space<vmem>>, vector<8x128xf32>
    tpu.vector_store %arg8[%c0_14, %c0_15], %35 {strides = array<i32>} : memref<8x128xf32, #tpu.memory_space<vmem>>, vector<8x128xf32>,
    return
  }
  func.func @transform_0(%arg0: i32) -> (i32, i32) {
    %c0_i32 = arith.constant 0 : i32
    %c0_i32_0 = arith.constant 0 : i32
    return %c0_i32, %arg0 : i32, i32
  }
  func.func @transform_1(%arg0: i32) -> (i32, i32) {
    %c0_i32 = arith.constant 0 : i32
    %c0_i32_0 = arith.constant 0 : i32
    %c0_i32_1 = arith.constant 0 : i32
    return %c0_i32, %c0_i32_0 : i32, i32
  }
  func.func @transform_2(%arg0: i32) -> (i32, i32) {
    %c0_i32 = arith.constant 0 : i32
    %c0_i32_0 = arith.constant 0 : i32
    %c0_i32_1 = arith.constant 0 : i32
    return %c0_i32, %c0_i32_0 : i32, i32
  }
  func.func @transform_3(%arg0: i32) -> (i32, i32) {
    %c0_i32 = arith.constant 0 : i32
    %c0_i32_0 = arith.constant 0 : i32
    %c0_i32_1 = arith.constant 0 : i32
    return %c0_i32, %c0_i32_0 : i32, i32
  }
  func.func @transform_4(%arg0: i32) -> (i32, i32) {
    %c0_i32 = arith.constant 0 : i32
    %c0_i32_0 = arith.constant 0 : i32
    %c0_i32_1 = arith.constant 0 : i32
    return %c0_i32, %c0_i32_0 : i32, i32
  }
  func.func @transform_5(%arg0: i32) -> (i32, i32) {
    %c0_i32 = arith.constant 0 : i32
    %c0_i32_0 = arith.constant 0 : i32
    %c0_i32_1 = arith.constant 0 : i32
    return %c0_i32, %c0_i32_0 : i32, i32
  }
  func.func @transform_6(%arg0: i32) -> (i32, i32) {
    %c0_i32 = arith.constant 0 : i32
    %c0_i32_0 = arith.constant 0 : i32
    %c0_i32_1 = arith.constant 0 : i32
    return %c0_i32, %c0_i32_0 : i32, i32
  }
  func.func @transform_7(%arg0: i32) -> (i32, i32) {
    %c0_i32 = arith.constant 0 : i32
    %c0_i32_0 = arith.constant 0 : i32
    return %c0_i32, %arg0 : i32, i32
  }
}

</mosaic_0001>

<bundles_post_ra>
// kernel: tpu_custom_call.1
= control target key start
LH: loop header
LB: loop body
LE: loop exit
PB: predicated region body
PF: predicated region fallthrough
CT: control target
= control target key end

     0   :  { %12 = vsyncpa [#allocation3], 0  ;;  %s1299_s0 = inlined_call_operand.vmem [shape: f32[3,256], index: 0, kind: input, shape index: {}]   ;;  %s1300_s1 = inlined_call_operand.vmem [shape: f32[64,3], index: 1, kind: input, shape index: {}]   ;;  %s1301_s2 = inlined_call_operand.vmem [shape: f32[64,1], index: 2, kind: input, shape index: {}]   ;;  %s1302_s3 = inlined_call_operand.vmem [shape: bf16[64,64], index: 3, kind: input, shape index: {}]   ;;  %s1303_s4 = inlined_call_operand.vmem [shape: f32[64,1], index: 4, kind: input, shape index: {}]   ;;  %s1304_s5 = inlined_call_operand.vmem [shape: bf16[8,64], index: 5, kind: input, shape index: {}]   ;;  %s1305_s6 = inlined_call_operand.vmem [shape: f32[8,1], index: 6, kind: input, shape index: {}]   ;;  %s1306_s7 = inlined_call_operand.hbm [shape: f32[8,256], index: 7, kind: output, shape index: {}]  }
   0x1   :  { %14 = vsyncpa [#allocation3 + $0x1], 0  ;;  %s1063_s24 = smov 0   ;;  %s1065_s25 = smov 0  }
   0x2   :  { %s1067_s26 = smov 0   ;;  %s1069_s27 = smov 0  }
   0x3 LB: > { %s1084_s28 = sadd.s32 4294967295, %s1015_s27   ;;  %s798_s29 = sadd.s32 4294967294, %s1015_s27   ;;  %s1015_s27 = sphi %s1069_s27, %s1312_s27   ;;  %s1011_s26 = sphi %s1067_s26, %s1311_s26   ;;  %s1007_s25 = sphi %s1065_s25, %s1310_s25   ;;  %s1003_s24 = sphi %s1063_s24, %s1309_s24  }
   0x4   : > { %s1088_s30 = sadd.s32 1, %s1015_s27   ;;  %s179_s8 = sadd.s32 1, %s1011_s26 }
   0x5   : > { %s176_s9 = ssub.s32 %s1015_s27, %s1088_s30  ;;  %p189_p0 = scmp.ne.s32.totalorder %s1011_s26, %s1007_s25 }
   0x6   : > { %p177_p1 = scmp.eq.s32.totalorder %s176_s9, 0  ;;  %p190_p2 = scmp.eq.s32.totalorder %s1084_s28, 1 }
   0x7   : > { %p195_p3 = scmp.ne.s32.totalorder %s1007_s25, %s1003_s24  ;;  %p196_p4 = scmp.eq.s32.totalorder %s798_s29, 1 }
   0x8   : > { %s1099_s10 = scalar_select %p177_p1, %s1011_s26, %s179_s8  }
   0x9   : > { %p1101_p5 = por %p190_p2, %p189_p0  ;;  %p1105_p6 = por %p196_p4, %p195_p3 }
   0xa   : > { %p801_p7 = scmp.ge.s32.totalorder %s1015_s27, 1  ;;  %p239_p8 = scmp.lt.s32.totalorder %s1015_s27, 3 }
   0xc   : > { %p240_p9 = pnand %p801_p7, %p239_p8 }
   0xd   : > { %v276_v0 = vld [vmem:[%s1300_s1] sm:$0xff] (!%p240_p9)  ;;  %v1017_v1 = vmov (!%p240_p9), 2   ;;  %v1018_v2 = vmov (!%p240_p9), 1   ;;  %v278_v3 = vld [vmem:[%s1300_s1 + $0x10] sm:$0xff] (!%p240_p9)  ;;  %v277_v4 = vld [vmem:[%s1300_s1 + $0x8] sm:$0xff] (!%p240_p9)  ;;  %v1019_v7 = vmov (!%p240_p9), 0   ;;  %v324_v35 = vlaneseq (!%p240_p9) }
   0xe   : > { %243 = sbr.rel (%p240_p9) target bundleno = 722 (0x2d2), region = 48  ;;  %903 = vset.pattern.permute.xlu0 (!%p240_p9), %v1017_v1  ;;  %902 = vset.pattern.permute.xlu1 (!%p240_p9), %v1018_v2  ;;  %v281_v5 = vld [vmem:[%s1300_s1 + $0x28] sm:$0xff] (!%p240_p9)  ;;  %v280_v6 = vld [vmem:[%s1300_s1 + $0x20] sm:$0xff] (!%p240_p9)  ;;  %v283_v8 = vld [vmem:[%s1300_s1 + $0x38] sm:$0xff] (!%p240_p9)  ;;  %vm584_vm0 = vcmask (!%p240_p9), 523264   ;;  %p270_p10 = scmp.lt.s32.totalorder (!%p240_p9), %s1084_s28, 1 }
   0xf   : > { %389 = vperm.xlu0 (!%p240_p9), %903, %v276_v0   ;;  %337 = vperm.xlu1 (!%p240_p9), %902, %v276_v0   ;;  %v279_v9 = vld [vmem:[%s1300_s1 + $0x18] sm:$0xff] (!%p240_p9)  ;;  %v440_v10 = vld [vmem:[%s1301_s2] sm:$0xff] (!%p240_p9)  ;;  %v441_v11 = vld [vmem:[%s1301_s2 + $0x8] sm:$0xff] (!%p240_p9)  ;;  %v325_v37 = vshrl.u32 (!%p240_p9), %v324_v35, 7  ;;  %vm1021_vm1 = vmmov (!%p240_p9), 0   ;;  %s267_s22 = sand.u32 (!%p240_p9), 1, %s1007_s25  }
  0x10   : > { %v282_v12 = vld [vmem:[%s1300_s1 + $0x30] sm:$0xff] (!%p240_p9)  ;;  %v444_v13 = vld [vmem:[%s1301_s2 + $0x20] sm:$0xff] (!%p240_p9)  ;;  %v447_v14 = vld [vmem:[%s1301_s2 + $0x38] sm:$0xff] (!%p240_p9)  ;;  %s1022_s17 = smov (!%p240_p9), [#allocation2]  }
  0x11   : > { %v517_v15 = vld [vmem:[%s1303_s4 + $0x8] sm:$0xff] (!%p240_p9)  ;;  %v519_v16 = vld [vmem:[%s1303_s4 + $0x18] sm:$0xff] (!%p240_p9)  ;;  %v442_v17 = vld [vmem:[%s1301_s2 + $0x10] sm:$0xff] (!%p240_p9)  ;;  %v370_v40 = vsub.s32 (!%p240_p9), 1, %v325_v37  ;;  %v326_v41 = vsub.s32 (!%p240_p9), 0, %v325_v37  ;;  %v422_v45 = vsub.s32 (!%p240_p9), 2, %v325_v37 }
  0x12   : > { %v521_v18 = vld [vmem:[%s1303_s4 + $0x28] sm:$0xff] (!%p240_p9)  ;;  %v443_v19 = vld [vmem:[%s1301_s2 + $0x18] sm:$0xff] (!%p240_p9)  ;;  %v446_v22 = vld [vmem:[%s1301_s2 + $0x30] sm:$0xff] (!%p240_p9)  ;;  %s957_s18 = sshll.u32 (!%p240_p9), %s1022_s17, 4  ;;  %s958_s18 = int_to_ptr.vmem [resolvable:$false] %s957_s18 }
  0x13   : > { %397 = vperm.xlu0 (!%p240_p9), %903, %v278_v3   ;;  %341 = vperm.xlu1 (!%p240_p9), %902, %v277_v4   ;;  %v523_v20 = vld [vmem:[%s1303_s4 + $0x38] sm:$0xff] (!%p240_p9)  ;;  %v445_v21 = vld [vmem:[%s1301_s2 + $0x28] sm:$0xff] (!%p240_p9)  ;;  %v516_v23 = vld [vmem:[%s1303_s4] sm:$0xff] (!%p240_p9)  ;;  %s959_s19 = scalar_lea.vmem (!%p240_p9), %s958_s18, 256 }
  0x14   : > { %v518_v24 = vld [vmem:[%s1303_s4 + $0x10] sm:$0xff] (!%p240_p9)  ;;  %v520_v25 = vld [vmem:[%s1303_s4 + $0x20] sm:$0xff] (!%p240_p9) }
  0x15   : > { %v522_v26 = vld [vmem:[%s1303_s4 + $0x30] sm:$0xff]  ;;  %v917_v27 = vld [vmem:[%s1302_s3] sm:$0xff]   ;;  %s271_s23 = scalar_select %p270_p10, %s1084_s28, 1 }
  0x16   : > { %v675_v28 = vld [vmem:[%s1305_s6] sm:$0xff]  ;;  %838 = vmatprep.mubr.msk.bf16.mxu0 %vm584_vm0, %v917_v27 }
  0x17   : > { %409 = vperm.xlu0 %903, %v281_v5   ;;  %904 = vset.pattern.permute.xlu1 %v1017_v1  ;;  %s803_s29 = sshll.u32 %s271_s23, 2  ;;  %s802_s23 = sshll.u32 %s267_s22, 3 }
  0x18   : > { %393 = vperm.xlu1 %904, %v277_v4   ;;  %s273_s13 = scalar_lea.vmem %s1299_s0, %s803_s29  ;;  %s814_s29 = sshll.u32 %s1084_s28, 7 }
  0x19   : > { %v275_v42 = vld [vmem:[%s273_s13] sm:$0x7]  ;;  %s269_s8 = scalar_lea.vmem [#allocation2], %s802_s23  ;;  %s1257_s15 = scalar_lea.hbm %s1306_s7, %s814_s29 }
  0x1a   : > { %v1204_v44 = vrot.slane %v275_v42, %v370_v40  ;;  %v1206_v46 = vrot.slane %v275_v42, %v326_v41  ;;  %v1210_v51 = vrot.slane %v275_v42, %v422_v45  ;;  %s739_s9 = sshll.u32 %s269_s8, 4  ;;  %s726_s28 = scalar_lea.sflag [#allocation3], %s267_s22  ;;  %s1259_s9 = int_to_ptr.vmem [resolvable:$true] %s739_s9 }
  0x1b   : > { %911 = vset.pattern.permute.xlu0 %v1018_v2  ;;  %s953_s16 = scalar_lea.vmem %s1259_s9, 128  ;;  %p960_p0 = scmp.lt.s32.totalorder %s1259_s9, %s958_s18 }
  0x1c   : > { %353 = vperm.xlu0 %911, %v280_v6   ;;  %905 = vset.pattern.permute.xlu1 %v1019_v7  ;;  %p954_p11 = scmp.ne.s32.totalorder %s1259_s9, %s953_s16  ;;  %p961_p1 = scmp.lt.s32.totalorder %s959_s19, %s953_s16 }
  0x1d   : > { %296 = vperm.xlu1 %905, %v278_v3  }
  0x1e   : > { %p955_p12 = pnand %p954_p11, %p1101_p5  ;;  %p962_p2 = por %p961_p1, %p960_p0 }
  0x20   : > { %365 = vperm.xlu0 %911, %v283_v8   ;;  %p956_p13 = pneg %p955_p12 }
  0x21   : > { %906 = vset.pattern.permute.xlu1 %v1018_v2 }
  0x22   : > { %345 = vperm.xlu1 %906, %v278_v3   ;;  %p963_p3 = pnand %p962_p2, %p956_p13 }
  0x24   : > { %914 = vset.pattern.permute.xlu0 %v1019_v7 }
  0x25   : > { %286 = vperm.xlu0 %914, %v276_v0  }
  0x26   : > { %349 = vperm.xlu1 %906, %v279_v9  }
  0x29   : > { %291 = vperm.xlu0 %914, %v277_v4  }
  0x2a   : > { %907 = vset.pattern.permute.xlu1 %v1017_v1 }
  0x2b   : > { %401 = vperm.xlu1 %907, %v279_v9  }
  0x2d   : > { %301 = vperm.xlu0 %914, %v279_v9  }
  0x2f   : > { %908 = vset.pattern.permute.xlu1 %v1019_v7 }
  0x30   : > { %450 = vperm.xlu1 %908, %v440_v10  }
  0x31   : > { %455 = vperm.xlu0 %914, %v441_v11  }
  0x34   : > { %306 = vperm.xlu1 %908, %v280_v6  }
  0x35   : > { %316 = vperm.xlu0 %914, %v282_v12  }
  0x38   : > { %311 = vperm.xlu1 %908, %v281_v5  }
  0x39   : > { %470 = vperm.xlu0 %914, %v444_v13  }
  0x3c   : > { %909 = vset.pattern.permute.xlu1 %v1018_v2 }
  0x3d   : > { %357 = vperm.xlu1 %909, %v281_v5   ;;  %485 = vperm.xlu0 %914, %v447_v14  }
  0x41   : > { %910 = vset.pattern.permute.xlu1 %v1017_v1  ;;  %531 = vperm.xlu0 %914, %v517_v15  }
  0x42   : > { %405 = vperm.xlu1 %910, %v280_v6  }
  0x45   : > { %541 = vperm.xlu0 %914, %v519_v16  }
  0x46   : > { %912 = vset.pattern.permute.xlu1 %v1019_v7 }
  0x47   : > { %460 = vperm.xlu1 %912, %v442_v17  }
  0x49   : > { %551 = vperm.xlu0 %914, %v521_v18  }
  0x4b   : > { %465 = vperm.xlu1 %912, %v443_v19  }
  0x4d   : > { %561 = vperm.xlu0 %914, %v523_v20  }
  0x4f   : > { %321 = vperm.xlu1 %912, %v283_v8  }
  0x53   : > { %913 = vset.pattern.permute.xlu1 %v1018_v2 }
  0x54   : > { %361 = vperm.xlu1 %913, %v282_v12  }
  0x58   : > { %915 = vset.pattern.permute.xlu1 %v1017_v1 }
  0x59   : > { %413 = vperm.xlu1 %915, %v282_v12  }
  0x5d   : > { %417 = vperm.xlu1 %915, %v283_v8  }
  0x61   : > { %916 = vset.pattern.permute.xlu1 %v1019_v7 }
  0x62   : > { %475 = vperm.xlu1 %916, %v445_v21  }
  0x66   : > { %480 = vperm.xlu1 %916, %v446_v22  }
  0x6a   : > { %526 = vperm.xlu1 %916, %v516_v23  }
  0x6e   : > { %536 = vperm.xlu1 %916, %v518_v24  }
  0x72   : > { %546 = vperm.xlu1 %916, %v520_v25  }
  0x76   : > { %556 = vperm.xlu1 %916, %v522_v26  }
  0x7a   : > { %678 = vperm.xlu1 %916, %v675_v28  }
  0x8e   : > { %v338_v29 = vpop.permute.xlu1 %337  ;;  %v390_v30 = vpop.permute.xlu0 %389 }
  0x8f   : > { %v372_v50 = vmul.f32 %v1204_v44, %v338_v29  ;;  %v424_v55 = vmul.f32 %v1210_v51, %v390_v30 }
  0x92   : > { %v342_v31 = vpop.permute.xlu1 %341  ;;  %v398_v32 = vpop.permute.xlu0 %397 }
  0x93   : > { %v373_v53 = vmul.f32 %v1204_v44, %v342_v31  ;;  %v426_v13 = vmul.f32 %v1210_v51, %v398_v32 }
  0x96   : > { %v1196_v33 = vpop.permute.xlu0 %409 }
  0x97   : > { %v394_v34 = vpop.permute.xlu1 %393 }
  0x98   : > { %v425_v60 = vmul.f32 %v1210_v51, %v394_v34 }
  0x9b   : > { %v354_v36 = vpop.permute.xlu0 %353 }
  0x9c   : > { %v297_v38 = vpop.permute.xlu1 %296  ;;  %v376_v26 = vmul.f32 %v1204_v44, %v354_v36 }
  0x9d   : > { %v330_v10 = vmul.f32 %v1206_v46, %v297_v38 }
  0x9f   : > { %v1202_v39 = vpop.permute.xlu0 %365 }
  0xa0   : > { %v379_v36 = vmul.f32 %v1204_v44, %v1202_v39 }
  0xa1   : > { %v346_v43 = vpop.permute.xlu1 %345 }
  0xa2   : > { %v374_v8 = vmul.f32 %v1204_v44, %v346_v43 }
  0xa4   : > { %v287_v47 = vpop.permute.xlu0 %286  ;;  %v382_v14 = vadd.f32 %v374_v8, %v330_v10 }
  0xa5   : > { %v350_v48 = vpop.permute.xlu1 %349  ;;  %v328_v49 = vmul.f32 %v1206_v46, %v287_v47 }
  0xa6   : > { %v375_v15 = vmul.f32 %v1204_v44, %v350_v48  ;;  %v434_v18 = vadd.f32 %v426_v13, %v382_v14 }
  0xa7   : > { %v380_v56 = vadd.f32 %v372_v50, %v328_v49  ;;  %v429_v49 = vmul.f32 %v1210_v51, %v1196_v33 }
  0xa8   : > { %v292_v52 = vpop.permute.xlu0 %291 }
  0xa9   : > { %v329_v54 = vmul.f32 %v1206_v46, %v292_v52  ;;  %v432_v61 = vadd.f32 %v424_v55, %v380_v56 }
  0xaa   : > { %v402_v57 = vpop.permute.xlu1 %401 }
  0xab   : > { %v381_v58 = vadd.f32 %v373_v53, %v329_v54  ;;  %v427_v19 = vmul.f32 %v1210_v51, %v402_v57 }
  0xac   : > { %v302_v59 = vpop.permute.xlu0 %301 }
  0xad   : > { %v433_v63 = vadd.f32 %v425_v60, %v381_v58  ;;  %v331_v11 = vmul.f32 %v1206_v46, %v302_v59 }
  0xaf   : > { %v451_v62 = vpop.permute.xlu1 %450  ;;  %v383_v16 = vadd.f32 %v375_v15, %v331_v11 }
  0xb0   : > { %v488_v0 = vadd.f32 %v451_v62, %v432_v61  ;;  %v456_v1 = vpop.permute.xlu0 %455 }
  0xb1   : > { %v489_v2 = vadd.f32 %v456_v1, %v433_v63  ;;  %v435_v21 = vadd.f32 %v427_v19, %v383_v16 }
  0xb2   : > { %921 = vtanh.f32 %v488_v0 }
  0xb3   : > { %923 = vtanh.f32 %v489_v2  ;;  %v307_v3 = vpop.permute.xlu1 %306  ;;  %v918_v2 = vld [vmem:[%s1302_s3 + $0x8] sm:$0xff]  }
  0xb4   : > { %v332_v27 = vmul.f32 %v1206_v46, %v307_v3  ;;  %v317_v29 = vpop.permute.xlu0 %316  ;;  %v919_v3 = vld [vmem:[%s1302_s3 + $0x10] sm:$0xff]  }
  0xb5   : > { %v334_v54 = vmul.f32 %v1206_v46, %v317_v29 }
  0xb6   : > { %v384_v37 = vadd.f32 %v376_v26, %v332_v27 }
  0xb7   : > { %v312_v4 = vpop.permute.xlu1 %311 }
  0xb8   : > { %v333_v40 = vmul.f32 %v1206_v46, %v312_v4  ;;  %v471_v42 = vpop.permute.xlu0 %470  ;;  %v920_v4 = vld [vmem:[%s1302_s3 + $0x18] sm:$0xff]  }
  0xbc   : > { %v922_v5 = vpop.eup %921  ;;  %v358_v6 = vpop.permute.xlu1 %357 }
  0xbd   : > { %v924_v7 = vpop.eup %923  ;;  %v377_v32 = vmul.f32 %v1204_v44, %v358_v6  ;;  %v486_v57 = vpop.permute.xlu0 %485 }
  0xbe   : > { %v504_v9 = vpack.c.bf16 %v924_v7, %v922_v5  ;;  %v1020_v5 = vmov 0.0  }
  0xbf   : > { %v385_v43 = vadd.f32 %v377_v32, %v333_v40  ;;  %846 = vmatprep.subr.bf16.mxu1 %v1020_v5  ;;  %854 = vmatprep.mubr.msk.bf16.mxu1 %vm1021_vm1, %v1020_v5 }
  0xc0   : > { %830 = vmatprep.subr.bf16.mxu0 %v504_v9 }
  0xc1   : > { %v406_v12 = vpop.permute.xlu1 %405  ;;  %831 = vmatpush3.bf16.msra.mxu0 %v504_v9  ;;  %v437_v39 = vadd.f32 %v429_v49, %v385_v43  ;;  %v532_v7 = vpop.permute.xlu0 %531 }
  0xc2   : > { %v428_v31 = vmul.f32 %v1210_v51, %v406_v12 }
  0xc4   : > { %v436_v41 = vadd.f32 %v428_v31, %v384_v37 }
  0xc5   : > { %v542_v9 = vpop.permute.xlu0 %541 }
  0xc6   : > { %v461_v17 = vpop.permute.xlu1 %460  ;;  %v492_v52 = vadd.f32 %v471_v42, %v436_v41 }
  0xc7   : > { %v490_v20 = vadd.f32 %v461_v17, %v434_v18 }
  0xc9   : > { %925 = vtanh.f32 %v490_v20  ;;  %v552_v18 = vpop.permute.xlu0 %551 }
  0xca   : > { %v466_v22 = vpop.permute.xlu1 %465 }
  0xcb   : > { %v491_v23 = vadd.f32 %v466_v22, %v435_v21 }
  0xcd   : > { %927 = vtanh.f32 %v491_v23 }
  0xce   : > { %v322_v24 = vpop.permute.xlu1 %321  ;;  %929 = vtanh.f32 %v492_v52 }
  0xcf   : > { %v335_v38 = vmul.f32 %v1206_v46, %v322_v24  ;;  %v562_v24 = vpop.permute.xlu0 %561 }
  0xd1   : > { %v387_v47 = vadd.f32 %v379_v36, %v335_v38 }
  0xd3   : > { %v362_v25 = vpop.permute.xlu1 %361  ;;  %v926_v28 = vpop.eup %925 }
  0xd4   : > { %v378_v50 = vmul.f32 %v1204_v44, %v362_v25 }
  0xd6   : > { %v386_v58 = vadd.f32 %v378_v50, %v334_v54 }
  0xd7   : > { %v928_v30 = vpop.eup %927 }
  0xd8   : > { %v414_v34 = vpop.permute.xlu1 %413  ;;  %v505_v35 = vpack.c.bf16 %v928_v30, %v926_v28  ;;  %v930_v33 = vpop.eup %929 }
  0xd9   : > { %v430_v55 = vmul.f32 %v1210_v51, %v414_v34 }
  0xda   : > { %832 = vmatprep.subr.bf16.mxu0 %v505_v35 }
  0xdb   : > { %833 = vmatpush3.bf16.msra.mxu0 %v505_v35  ;;  %v438_v61 = vadd.f32 %v430_v55, %v386_v58 }
  0xdc   : > { %v418_v45 = vpop.permute.xlu1 %417 }
  0xdd   : > { %v431_v48 = vmul.f32 %v1210_v51, %v418_v45  ;;  %v674_v45 = vld [vmem:[%s1304_s5] sm:$0xf] }
  0xdf   : > { %v439_v53 = vadd.f32 %v431_v48, %v387_v47 }
  0xe1   : > { %v476_v56 = vpop.permute.xlu1 %475  ;;  %v495_v60 = vadd.f32 %v486_v57, %v439_v53 }
  0xe2   : > { %v493_v59 = vadd.f32 %v476_v56, %v437_v39 }
  0xe4   : > { %931 = vtanh.f32 %v493_v59 }
  0xe5   : > { %v481_v62 = vpop.permute.xlu1 %480  ;;  %933 = vtanh.f32 %v495_v60 }
  0xe6   : > { %v494_v63 = vadd.f32 %v481_v62, %v438_v61 }
  0xe8   : > { %935 = vtanh.f32 %v494_v63 }
  0xe9   : > { %v527_v6 = vpop.permute.xlu1 %526 }
  0xed   : > { %v537_v8 = vpop.permute.xlu1 %536 }
  0xee   : > { %v932_v44 = vpop.eup %931 }
  0xef   : > { %v506_v0 = vpack.c.bf16 %v932_v44, %v930_v33  ;;  %v934_v1 = vpop.eup %933 }
  0xf1   : > { %834 = vmatprep.subr.bf16.mxu0 %v506_v0  ;;  %v547_v13 = vpop.permute.xlu1 %546 }
  0xf2   : > { %v936_v46 = vpop.eup %935  ;;  %835 = vmatpush3.bf16.msra.mxu0 %v506_v0 }
  0xf3   : > { %v507_v51 = vpack.c.bf16 %v934_v1, %v936_v46 }
  0xf5   : > { %836 = vmatprep.subr.bf16.mxu0 %v507_v51  ;;  %v557_v20 = vpop.permute.xlu1 %556 }
  0xf6   : > { %837 = vmatpush3.bf16.msra.mxu0 %v507_v51 }
  0xf9   : > { %839 = vmatmul.mubr.msk.bf16.vlgmr.msra.gmra.mrb[0].mxu0 %vm584_vm0, %v918_v2  ;;  %v679_v47 = vpop.permute.xlu1 %678 }
  0xfa   : > { %842 = vmatprep.mubr.msk.bf16.mxu0 %vm584_vm0, %v919_v3 }
 0x101   : > { %843 = vmatmul.mubr.msk.bf16.gmra.mrb[4].mxu0 %vm584_vm0, %v920_v4 }
 0x1cc   : > { %v840_v10 = vpop.f32.mrb[0].mxu0 }
 0x1cd   : > { %v640_v11 = vadd.f32 %v840_v10, %v537_v8  ;;  %v631_v12 = vpop.f32.mrb[1].mxu0 }
 0x1ce   : > { %v632_v14 = vadd.f32 %v631_v12, %v527_v6  ;;  %v841_v15 = vpop.f32.mrb[2].mxu0 }
 0x1cf   : > { %937 = vtanh.f32 %v640_v11  ;;  %v643_v16 = vadd.f32 %v841_v15, %v542_v9  ;;  %v634_v17 = vpop.f32.mrb[3].mxu0 }
 0x1d0   : > { %939 = vtanh.f32 %v632_v14  ;;  %v635_v19 = vadd.f32 %v634_v17, %v532_v7 }
 0x1d1   : > { %941 = vtanh.f32 %v643_v16 }
 0x1d2   : > { %943 = vtanh.f32 %v635_v19 }
 0x1d4   : > { %v844_v21 = vpop.f32.mrb[4].mxu0 }
 0x1d5   : > { %v656_v22 = vadd.f32 %v844_v21, %v557_v20  ;;  %v647_v23 = vpop.f32.mrb[5].mxu0 }
 0x1d6   : > { %v648_v25 = vadd.f32 %v647_v23, %v547_v13  ;;  %v845_v26 = vpop.f32.mrb[6].mxu0 }
 0x1d7   : > { %945 = vtanh.f32 %v656_v22  ;;  %v659_v27 = vadd.f32 %v845_v26, %v562_v24  ;;  %v650_v28 = vpop.f32.mrb[7].mxu0 }
 0x1d8   : > { %947 = vtanh.f32 %v648_v25  ;;  %v651_v29 = vadd.f32 %v650_v28, %v552_v18 }
 0x1d9   : > { %v938_v30 = vpop.eup %937  ;;  %949 = vtanh.f32 %v659_v27 }
 0x1da   : > { %v940_v31 = vpop.eup %939  ;;  %951 = vtanh.f32 %v651_v29 }
 0x1db   : > { %v942_v32 = vpop.eup %941 }
 0x1dc   : > { %v944_v34 = vpop.eup %943  ;;  %v671_v35 = vpack.c.bf16 %v942_v32, %v938_v30 }
 0x1dd   : > { %v670_v37 = vpack.c.bf16 %v944_v34, %v940_v31 }
 0x1df   : > { %847 = vmatpush3.bf16.msra.mxu1 %v670_v37 }
 0x1e0   : > { %848 = vmatprep.subr.bf16.mxu1 %v1020_v5 }
 0x1e1   : > { %v946_v38 = vpop.eup %945 }
 0x1e2   : > { %v948_v40 = vpop.eup %947 }
 0x1e3   : > { %v950_v36 = vpop.eup %949  ;;  %849 = vmatpush3.bf16.msra.mxu1 %v671_v35 }
 0x1e4   : > { %v952_v41 = vpop.eup %951  ;;  %850 = vmatprep.subr.bf16.mxu1 %v1020_v5  ;;  %v673_v42 = vpack.c.bf16 %v950_v36, %v946_v38 }
 0x1e5   : > { %v672_v43 = vpack.c.bf16 %v952_v41, %v948_v40 }
 0x1e7   : > { %851 = vmatpush3.bf16.msra.mxu1 %v672_v43 }
 0x1e8   : > { %852 = vmatprep.subr.bf16.mxu1 %v1020_v5 }
 0x1eb   : > { %853 = vmatpush3.bf16.msra.mxu1 %v673_v42 }
 0x1ee   : > { %855 = vmatmul.mubr.msk.bf16.vlgmr.msra.gmra.mrb[0].mxu1 %vm584_vm0, %v674_v45 }
 0x2c1   : > { %v718_v48 = vpop.f32.mrb[0].mxu1 }
 0x2c2   : > { %v719_v49 = vadd.f32 %v718_v48, %v679_v47  ;;  %v856_v50 = vpop.f32.mrb[1].mxu1 }
 0x2c3   : > { %v721_v52 = vpop.f32.mrb[2].mxu1 }
 0x2c4   : > { %724 = vst [vmem:[%s269_s8] sm:$0xff] %v719_v49  ;;  %v857_v53 = vpop.f32.mrb[3].mxu1 }
 0x2c5   : > { %966 = shalt.err (!%p963_p3)
}
 0x2c6   : > { %s967_s20 = scalar_lea.hbm %s1257_s15, 128  ;;  %s971_s23 = scalar_lea.hbm %s1306_s7, 256 }
 0x2c7   : > { %p968_p4 = scmp.ne.s32.totalorder %s1257_s15, %s967_s20  ;;  %p972_p9 = scmp.lt.u32.totalorder %s1257_s15, %s1306_s7 }
 0x2c8   : > { %p973_p10 = scmp.lt.u32.totalorder %s971_s23, %s967_s20  ;;  %p975_p12 = scmp.lt.u32.totalorder %s967_s20, %s1257_s15 }
 0x2c9   : > { %p969_p7 = pnand %p968_p4, %p1101_p5 }
 0x2ca   : > { %p974_p11 = por %p973_p10, %p972_p9 }
 0x2cb   : > { %p970_p8 = pneg %p969_p7 }
 0x2cc   : > { %p976_p13 = por %p975_p12, %p974_p11 }
 0x2ce   : > { %p977_p0 = pnand %p976_p13, %p970_p8 }
 0x2d0   : > { %980 = shalt.err (!%p977_p0)
}
 0x2d1   : > { %858 = dma.vmem_to_hbm [thread:$0]  (%p1101_p5), %s1259_s9, 128, %s1257_s15, %s726_s28  }
 0x2d2 PF: > { %p864_p1 = scmp.ge.s32.totalorder %s1015_s27, 2  ;;  %s751_s13 = sand.u32 1, %s1003_s24  }
 0x2d3   : > { %s752_s14 = scalar_lea.sflag [#allocation3], %s751_s13 }
 0x2d4   : > { %p861_p2 = pnand %p864_p1, %p1105_p6 }
 0x2d6   : > { %998 = dma.done.wait (!%p861_p2), %s752_s14, 128  }
 0x2d7   : > { %1000 = vsyncadd (!%p861_p2), %s752_s14, 4294967168  ;;  %p17_p3 = scmp.ge.s32.totalorder %s1088_s30, 4   ;;  %s1309_s24 = smov %s1007_s25 }
 0x2d8   : > { %s1310_s25 = smov %s1011_s26  ;;  %s1311_s26 = smov %s1099_s10 }
 0x2d9   : > { %s1312_s27 = smov %s1088_s30  ;;  %19 = sbr.rel (!%p17_p3) target bundleno = 3 (0x3), region = 83 }
 0x2e0   :  { %757 = vsyncpa [#allocation3], 1 }
 0x2e1   :  { %759 = vsyncpa [#allocation3 + $0x1], 1 }

</bundles_post_ra>
